<compile_context>
chip_gen: v6e
topology: v6e:2x2x1
jax: 0.10.0
libtpu: 0.0.40
codegen_flags: <defaults>
</compile_context>

<pallas_src>
import jax
import jax.numpy as jnp
from jax.experimental import pallas as pl
from jax.experimental.pallas import tpu as pltpu

# ---- problem sizes (small, consistent with the module) ----
N = 256        # number of nodes
P = 3          # pos_ind (per-position feature dim)
H = 32         # p_hs (hidden size of the positional encoder)
DROPRATIO = 0.2  # unused at inference
TN = 256       # node tile -> single grid step (collapse per perf review)
EPS = 1e-5


# ----------------------------------------------------------------------------
# Fused kernel: [TN, 2P] -> Linear(+BN1 folded) -> ReLU -> Linear(+BN2 folded)
# ----------------------------------------------------------------------------
def multi_pos_emb_kernel(p12_ref, w1_ref, b1_ref, w2_ref, b2_ref, out_ref):
    p12 = p12_ref[...]                                     # [TN, 2P]
    # layer 1: Conv1d(3P,H,k=1) + BatchNorm1d (eval, pre-folded) -> MXU matmul
    h = jnp.dot(p12, w1_ref[...],
                preferred_element_type=jnp.float32) + b1_ref[...]   # [TN, H]
    h = jnp.maximum(h, 0.0)                                # ReLU(inplace=True)
    # Dropout: identity (inference)
    # layer 2: Conv1d(H,H,k=1) + BatchNorm1d (eval, pre-folded)
    out_ref[...] = jnp.dot(h, w2_ref[...],
                           preferred_element_type=jnp.float32) + b2_ref[...]


# ----------------------------------------------------------------------------
# Wrapper: fold cat + BatchNorm into effective weights, single pallas_call
# ----------------------------------------------------------------------------
@jax.jit
def multi_pos_emb_forward(pos1, pos2, params):
    n, p = pos1.shape

    # BatchNorm1d (eval) -> per-channel scale/shift
    s1 = params['bn1_gamma'] / jnp.sqrt(params['bn1_var'] + EPS)
    t1 = params['bn1_beta'] - params['bn1_mean'] * s1
    s2 = params['bn2_gamma'] / jnp.sqrt(params['bn2_var'] + EPS)
    t2 = params['bn2_beta'] - params['bn2_mean'] * s2

    # cat([pos1, pos2, pos1-pos2]) @ W1.T
    #   == pos1 @ (Wa + Wc).T + pos2 @ (Wb - Wc).T
    w1 = params['w1']                                      # [H, 3P]  (conv1 weight)
    w1a, w1b, w1c = w1[:, :p], w1[:, p:2 * p], w1[:, 2 * p:]
    w1_eff = jnp.concatenate([(w1a + w1c).T,
                              (w1b - w1c).T], axis=0) * s1[None, :]   # [2P, H]
    b1_eff = (params['b1'] * s1 + t1)[None, :]                        # [1, H]
    w2_eff = params['w2'].T * s2[None, :]                             # [H, H]
    b2_eff = (params['b2'] * s2 + t2)[None, :]                        # [1, H]

    pos12 = jnp.concatenate([pos1, pos2], axis=1)                     # [N, 2P]

    grid = (pl.cdiv(n, TN),)   # == (1,) at these sizes
    out = pl.pallas_call(
        multi_pos_emb_kernel,
        out_shape=jax.ShapeDtypeStruct((n, H), jnp.float32),
        grid=grid,
        in_specs=[
            pl.BlockSpec((TN, 2 * p), lambda i: (i, 0)),   # node tile
            pl.BlockSpec((2 * p, H), lambda i: (0, 0)),    # W1 (folded)
            pl.BlockSpec((1, H), lambda i: (0, 0)),        # b1 (folded)
            pl.BlockSpec((H, H), lambda i: (0, 0)),        # W2 (folded)
            pl.BlockSpec((1, H), lambda i: (0, 0)),        # b2 (folded)
        ],
        out_specs=pl.BlockSpec((TN, H), lambda i: (i, 0)),
        compiler_params=pltpu.CompilerParams(
            # node tiles are independent -> shard across v7x's 2 TensorCores
            dimension_semantics=("parallel",)),
    )(pos12, w1_eff, b1_eff, w2_eff, b2_eff)
    return out


# ----------------------------------------------------------------------------
# Deterministic parameter init (shapes follow the PyTorch module __init__)
# ----------------------------------------------------------------------------
def init_params(key):
    ks = jax.random.split(key, 10)
    f32 = jnp.float32
    pms = {}
    pms['w1'] = jax.random.normal(ks[0], (H, 3 * P), f32) * 0.1   # Conv1d(3P,H,1).weight
    pms['b1'] = jax.random.normal(ks[1], (H,), f32) * 0.1
    pms['w2'] = jax.random.normal(ks[2], (H, H), f32) * 0.1       # Conv1d(H,H,1).weight
    pms['b2'] = jax.random.normal(ks[3], (H,), f32) * 0.1
    # non-trivial BatchNorm running stats (eval mode) to exercise the fold
    pms['bn1_gamma'] = 1.0 + 0.1 * jax.random.normal(ks[4], (H,), f32)
    pms['bn1_beta'] = 0.1 * jax.random.normal(ks[5], (H,), f32)
    pms['bn1_mean'] = 0.1 * jax.random.normal(ks[6], (H,), f32)
    pms['bn1_var'] = jax.random.uniform(ks[7], (H,), f32, 0.5, 1.5)
    pms['bn2_gamma'] = 1.0 + 0.1 * jax.random.normal(ks[8], (H,), f32)
    pms['bn2_beta'] = 0.1 * jax.random.normal(ks[9], (H,), f32)
    pms['bn2_mean'] = jnp.zeros((H,), f32)
    pms['bn2_var'] = jnp.ones((H,), f32)
    return pms


# ----------------------------------------------------------------------------
# Pure-JAX reference (mirrors the PyTorch forward) for a correctness check
# ----------------------------------------------------------------------------
def reference_forward(pos1, pos2, pms):
    x = jnp.concatenate([pos1, pos2, pos1 - pos2], axis=1)          # [N, 3P]
    h = x @ pms['w1'].T + pms['b1']
    h = ((h - pms['bn1_mean']) / jnp.sqrt(pms['bn1_var'] + EPS)
         * pms['bn1_gamma'] + pms['bn1_beta'])
    h = jnp.maximum(h, 0.0)
    # Dropout: identity at eval
    h = h @ pms['w2'].T + pms['b2']
    h = ((h - pms['bn2_mean']) / jnp.sqrt(pms['bn2_var'] + EPS)
         * pms['bn2_gamma'] + pms['bn2_beta'])
    return h


if __name__ == "__main__":
    key = jax.random.PRNGKey(0)
    k1, k2, kp = jax.random.split(key, 3)
    pos1 = jax.random.normal(k1, (N, P), jnp.float32)
    pos2 = jax.random.normal(k2, (N, P), jnp.float32)
    params = init_params(kp)

    out = jax.block_until_ready(multi_pos_emb_forward(pos1, pos2, params))
    ref = jax.block_until_ready(reference_forward(pos1, pos2, params))

    assert out.shape == (N, H), out.shape
    assert jnp.allclose(out, ref, rtol=1e-3, atol=1e-3), (out, ref)
    print("KERNEL_OK")
</pallas_src>

<mosaic_0001>
module attributes {stable_mosaic.version = 11 : i64} {
  func.func @multi_pos_emb_kernel(%arg0: i32, %arg1: memref<256x6xf32, #tpu.memory_space<vmem>>, %arg2: memref<6x32xf32, #tpu.memory_space<vmem>>, %arg3: memref<1x32xf32, #tpu.memory_space<vmem>>, %arg4: memref<32x32xf32, #tpu.memory_space<vmem>>, %arg5: memref<1x32xf32, #tpu.memory_space<vmem>>, %arg6: memref<256x32xf32, #tpu.memory_space<vmem>>) attributes {dimension_semantics = [#tpu.dimension_semantics<parallel>], iteration_bounds = array<i64: 1>, scalar_prefetch = 0 : i64, scratch_operands = 0 : i64, tpu.core_type = #tpu.core_type<tc>, window_params = [{transform_indices = @transform_0, window_bounds = array<i64: 256, 6>}, {pipeline_mode = #tpu.pipeline_mode<synchronous>, transform_indices = @transform_1, window_bounds = array<i64: 6, 32>}, {pipeline_mode = #tpu.pipeline_mode<synchronous>, transform_indices = @transform_2, window_bounds = array<i64: 1, 32>}, {pipeline_mode = #tpu.pipeline_mode<synchronous>, transform_indices = @transform_3, window_bounds = array<i64: 32, 32>}, {pipeline_mode = #tpu.pipeline_mode<synchronous>, transform_indices = @transform_4, window_bounds = array<i64: 1, 32>}, {transform_indices = @transform_5, window_bounds = array<i64: 256, 32>}]} {
    %c0 = arith.constant 0 : index
    %c0_0 = arith.constant 0 : index
    %0 = vector.load %arg1[%c0, %c0_0] : memref<256x6xf32, #tpu.memory_space<vmem>>, vector<256x6xf32>
    %c0_1 = arith.constant 0 : index
    %c0_2 = arith.constant 0 : index
    %1 = vector.load %arg2[%c0_1, %c0_2] : memref<6x32xf32, #tpu.memory_space<vmem>>, vector<6x32xf32>
    %cst = arith.constant dense<0.000000e+00> : vector<256x32xf32>
    %2 = tpu.matmul %0, %1, %cst {dimension_numbers = #tpu.dot_dimension_numbers<[1], [0], [0], [1], [0, 0, 1, 1], [], []>} : vector<256x6xf32>, vector<6x32xf32>, vector<256x32xf32> -> vector<256x32xf32>
    %c0_3 = arith.constant 0 : index
    %c0_4 = arith.constant 0 : index
    %3 = vector.load %arg3[%c0_3, %c0_4] : memref<1x32xf32, #tpu.memory_space<vmem>>, vector<1x32xf32>
    %4 = vector.broadcast %3 : vector<1x32xf32> to vector<256x32xf32>
    %5 = arith.addf %2, %4 : vector<256x32xf32>
    %cst_5 = arith.constant 0.000000e+00 : f32
    %6 = vector.broadcast %cst_5 : f32 to vector<256x32xf32>
    %7 = arith.maximumf %5, %6 : vector<256x32xf32>
    %c0_6 = arith.constant 0 : index
    %c0_7 = arith.constant 0 : index
    %8 = vector.load %arg4[%c0_6, %c0_7] : memref<32x32xf32, #tpu.memory_space<vmem>>, vector<32x32xf32>
    %cst_8 = arith.constant dense<0.000000e+00> : vector<256x32xf32>
    %9 = tpu.matmul %7, %8, %cst_8 {dimension_numbers = #tpu.dot_dimension_numbers<[1], [0], [0], [1], [0, 0, 1, 1], [], []>} : vector<256x32xf32>, vector<32x32xf32>, vector<256x32xf32> -> vector<256x32xf32>
    %c0_9 = arith.constant 0 : index
    %c0_10 = arith.constant 0 : index
    %10 = vector.load %arg5[%c0_9, %c0_10] : memref<1x32xf32, #tpu.memory_space<vmem>>, vector<1x32xf32>
    %11 = vector.broadcast %10 : vector<1x32xf32> to vector<256x32xf32>
    %12 = arith.addf %9, %11 : vector<256x32xf32>
    %c0_11 = arith.constant 0 : index
    %c0_12 = arith.constant 0 : index
    %13 = vector.load %arg6[%c0_11, %c0_12] : memref<256x32xf32, #tpu.memory_space<vmem>>, vector<256x32xf32>
    tpu.vector_store %arg6[%c0_11, %c0_12], %12 {strides = array<i32>} : memref<256x32xf32, #tpu.memory_space<vmem>>, vector<256x32xf32>,
    return
  }
  func.func @transform_0(%arg0: i32) -> (i32, i32) {
    %c0_i32 = arith.constant 0 : i32
    %c0_i32_0 = arith.constant 0 : i32
    return %arg0, %c0_i32 : i32, i32
  }
  func.func @transform_1(%arg0: i32) -> (i32, i32) {
    %c0_i32 = arith.constant 0 : i32
    %c0_i32_0 = arith.constant 0 : i32
    %c0_i32_1 = arith.constant 0 : i32
    return %c0_i32, %c0_i32_0 : i32, i32
  }
  func.func @transform_2(%arg0: i32) -> (i32, i32) {
    %c0_i32 = arith.constant 0 : i32
    %c0_i32_0 = arith.constant 0 : i32
    %c0_i32_1 = arith.constant 0 : i32
    return %c0_i32, %c0_i32_0 : i32, i32
  }
  func.func @transform_3(%arg0: i32) -> (i32, i32) {
    %c0_i32 = arith.constant 0 : i32
    %c0_i32_0 = arith.constant 0 : i32
    %c0_i32_1 = arith.constant 0 : i32
    return %c0_i32, %c0_i32_0 : i32, i32
  }
  func.func @transform_4(%arg0: i32) -> (i32, i32) {
    %c0_i32 = arith.constant 0 : i32
    %c0_i32_0 = arith.constant 0 : i32
    %c0_i32_1 = arith.constant 0 : i32
    return %c0_i32, %c0_i32_0 : i32, i32
  }
  func.func @transform_5(%arg0: i32) -> (i32, i32) {
    %c0_i32 = arith.constant 0 : i32
    %c0_i32_0 = arith.constant 0 : i32
    return %arg0, %c0_i32 : i32, i32
  }
}

</mosaic_0001>

<bundles_post_ra>
// kernel: multi_pos_emb_forward.1
= control target key start
LH: loop header
LB: loop body
LE: loop exit
PB: predicated region body
PF: predicated region fallthrough
CT: control target
= control target key end

     0   :  { %vm157_vm0 = vcmask 1045504   ;;  %vm60_vm1 = vcmask 48128   ;;  %vm429_vm2 = vcmask 261120   ;;  %s1436_s1 = inlined_call_operand.vmem [shape: f32[6,32], index: 1, kind: input, shape index: {}]   ;;  %s1437_s0 = inlined_call_operand.vmem [shape: f32[256,6], index: 0, kind: input, shape index: {}]   ;;  %s1438_s3 = inlined_call_operand.vmem [shape: f32[32,32], index: 3, kind: input, shape index: {}]   ;;  %s1439_s2 = inlined_call_operand.vmem [shape: f32[1,32], index: 2, kind: input, shape index: {}]   ;;  %s1440_s4 = inlined_call_operand.vmem [shape: f32[1,32], index: 4, kind: input, shape index: {}]   ;;  %s1441_s5 = inlined_call_operand.vmem [shape: f32[256,32], index: 5, kind: output, shape index: {}]  }
   0x1   :  { %v52_v0 = vld [vmem:[%s1436_s1] sm:$0x3f]  ;;  %v21_v2 = vld [vmem:[%s1437_s0 + $0x8] sm:$0xff]  ;;  %v22_v3 = vld [vmem:[%s1437_s0 + $0x10] sm:$0xff] }
   0x2   :  { %v20_v1 = vld [vmem:[%s1437_s0] sm:$0xff]  ;;  %923 = vmatprep.subr.msk.mxu0 %vm157_vm0, %v52_v0  ;;  %v23_v4 = vld [vmem:[%s1437_s0 + $0x18] sm:$0xff]  ;;  %v25_v6 = vld [vmem:[%s1437_s0 + $0x28] sm:$0xff] }
   0x3   :  { %925 = vmatprep.mubr.msk.f32.mxu0 %vm60_vm1, %v20_v1  ;;  %924 = vmatpush3.msk.msra.mxu0 %vm157_vm0, %v52_v0  ;;  %v24_v5 = vld [vmem:[%s1437_s0 + $0x20] sm:$0xff]  ;;  %v26_v7 = vld [vmem:[%s1437_s0 + $0x30] sm:$0xff]  ;;  %v27_v8 = vld [vmem:[%s1437_s0 + $0x38] sm:$0xff] }
   0x4   :  { %926 = vmatmul.mubr.msk.f32.vlgmr.msra.gmra.mxu0 %vm60_vm1, %v21_v2  ;;  %v28_v9 = vld [vmem:[%s1437_s0 + $0x40] sm:$0xff]  ;;  %v29_v10 = vld [vmem:[%s1437_s0 + $0x48] sm:$0xff]  ;;  %v30_v11 = vld [vmem:[%s1437_s0 + $0x50] sm:$0xff] }
   0x5   :  { %928 = vmatprep.mubr.msk.f32.mxu0 %vm60_vm1, %v22_v3  ;;  %v31_v12 = vld [vmem:[%s1437_s0 + $0x58] sm:$0xff]  ;;  %v32_v13 = vld [vmem:[%s1437_s0 + $0x60] sm:$0xff]  ;;  %v33_v14 = vld [vmem:[%s1437_s0 + $0x68] sm:$0xff] }
   0x6   :  { %v34_v15 = vld [vmem:[%s1437_s0 + $0x70] sm:$0xff]  ;;  %v35_v16 = vld [vmem:[%s1437_s0 + $0x78] sm:$0xff]  ;;  %v36_v17 = vld [vmem:[%s1437_s0 + $0x80] sm:$0xff] }
   0x7   :  { %v37_v18 = vld [vmem:[%s1437_s0 + $0x88] sm:$0xff]  ;;  %v38_v19 = vld [vmem:[%s1437_s0 + $0x90] sm:$0xff]  ;;  %v39_v20 = vld [vmem:[%s1437_s0 + $0x98] sm:$0xff] }
   0x8   :  { %929 = vmatmul.mubr.msk.f32.gmra.mxu0 %vm60_vm1, %v23_v4  ;;  %v40_v21 = vld [vmem:[%s1437_s0 + $0xa0] sm:$0xff]  ;;  %v41_v22 = vld [vmem:[%s1437_s0 + $0xa8] sm:$0xff]  ;;  %v42_v23 = vld [vmem:[%s1437_s0 + $0xb0] sm:$0xff] }
   0x9   :  { %931 = vmatprep.mubr.msk.f32.mxu0 %vm60_vm1, %v24_v5  ;;  %v43_v24 = vld [vmem:[%s1437_s0 + $0xb8] sm:$0xff]  ;;  %v44_v25 = vld [vmem:[%s1437_s0 + $0xc0] sm:$0xff]  ;;  %v45_v26 = vld [vmem:[%s1437_s0 + $0xc8] sm:$0xff] }
   0xa   :  { %v46_v27 = vld [vmem:[%s1437_s0 + $0xd0] sm:$0xff]  ;;  %v47_v28 = vld [vmem:[%s1437_s0 + $0xd8] sm:$0xff]  ;;  %v48_v29 = vld [vmem:[%s1437_s0 + $0xe0] sm:$0xff] }
   0xb   :  { %v49_v30 = vld [vmem:[%s1437_s0 + $0xe8] sm:$0xff]  ;;  %v50_v31 = vld [vmem:[%s1437_s0 + $0xf0] sm:$0xff]  ;;  %v51_v32 = vld [vmem:[%s1437_s0 + $0xf8] sm:$0xff] }
   0xc   :  { %932 = vmatmul.mubr.msk.f32.gmra.mxu0 %vm60_vm1, %v25_v6  ;;  %v421_v33 = vld [vmem:[%s1438_s3 + $0x18] sm:$0xff]  ;;  %v420_v34 = vld [vmem:[%s1438_s3 + $0x10] sm:$0xff]  ;;  %v419_v35 = vld [vmem:[%s1438_s3 + $0x8] sm:$0xff] }
   0xd   :  { %934 = vmatprep.mubr.msk.f32.mxu0 %vm60_vm1, %v26_v7  ;;  %973 = vmatprep.subr.mxu1 %v421_v33  ;;  %v418_v36 = vld [vmem:[%s1438_s3] sm:$0xff] }
   0xe   :  { %974 = vmatpush3.msra.mxu1 %v421_v33  ;;  %v1205_v37 = vld [vmem:[%s1439_s2] ss:$0 sm:$0xff] }
   0xf   :  { %975 = vmatprep.subr.mxu1 %v420_v34 }
  0x10   :  { %935 = vmatmul.mubr.msk.f32.gmra.mxu0 %vm60_vm1, %v27_v8  ;;  %976 = vmatpush3.msra.mxu1 %v420_v34 }
  0x11   :  { %937 = vmatprep.mubr.msk.f32.mxu0 %vm60_vm1, %v28_v9  ;;  %977 = vmatprep.subr.mxu1 %v419_v35 }
  0x12   :  { %978 = vmatpush3.msra.mxu1 %v419_v35 }
  0x13   :  { %979 = vmatprep.subr.mxu1 %v418_v36 }
  0x14   :  { %938 = vmatmul.mubr.msk.f32.gmra.mxu0 %vm60_vm1, %v29_v10  ;;  %980 = vmatpush3.msra.mxu1 %v418_v36 }
  0x15   :  { %940 = vmatprep.mubr.msk.f32.mxu0 %vm60_vm1, %v30_v11 }
  0x18   :  { %941 = vmatmul.mubr.msk.f32.gmra.mxu0 %vm60_vm1, %v31_v12 }
  0x19   :  { %943 = vmatprep.mubr.msk.f32.mxu0 %vm60_vm1, %v32_v13 }
  0x1c   :  { %944 = vmatmul.mubr.msk.f32.gmra.mxu0 %vm60_vm1, %v33_v14 }
  0x1d   :  { %946 = vmatprep.mubr.msk.f32.mxu0 %vm60_vm1, %v34_v15 }
  0x20   :  { %947 = vmatmul.mubr.msk.f32.gmra.mxu0 %vm60_vm1, %v35_v16 }
  0x21   :  { %949 = vmatprep.mubr.msk.f32.mxu0 %vm60_vm1, %v36_v17 }
  0x24   :  { %950 = vmatmul.mubr.msk.f32.gmra.mxu0 %vm60_vm1, %v37_v18 }
  0x25   :  { %952 = vmatprep.mubr.msk.f32.mxu0 %vm60_vm1, %v38_v19 }
  0x28   :  { %953 = vmatmul.mubr.msk.f32.gmra.mxu0 %vm60_vm1, %v39_v20 }
  0x29   :  { %955 = vmatprep.mubr.msk.f32.mxu0 %vm60_vm1, %v40_v21 }
  0x2c   :  { %956 = vmatmul.mubr.msk.f32.gmra.mxu0 %vm60_vm1, %v41_v22 }
  0x2d   :  { %958 = vmatprep.mubr.msk.f32.mxu0 %vm60_vm1, %v42_v23 }
  0x30   :  { %959 = vmatmul.mubr.msk.f32.gmra.mxu0 %vm60_vm1, %v43_v24 }
  0x31   :  { %961 = vmatprep.mubr.msk.f32.mxu0 %vm60_vm1, %v44_v25 }
  0x34   :  { %962 = vmatmul.mubr.msk.f32.gmra.mxu0 %vm60_vm1, %v45_v26 }
  0x35   :  { %964 = vmatprep.mubr.msk.f32.mxu0 %vm60_vm1, %v46_v27 }
  0x38   :  { %965 = vmatmul.mubr.msk.f32.gmra.mxu0 %vm60_vm1, %v47_v28 }
  0x39   :  { %967 = vmatprep.mubr.msk.f32.mxu0 %vm60_vm1, %v48_v29 }
  0x3c   :  { %968 = vmatmul.mubr.msk.f32.gmra.mxu0 %vm60_vm1, %v49_v30 }
  0x3d   :  { %970 = vmatprep.mubr.msk.f32.mxu0 %vm60_vm1, %v50_v31 }
  0x40   :  { %971 = vmatmul.mubr.msk.f32.gmra.mxu0 %vm60_vm1, %v51_v32 }
  0xc4   :  { %v927_v38 = vpop.f32.mrf.mxu0 }
  0xc5   :  { %v233_v39 = vadd.f32 %v927_v38, %v1205_v37 }
  0xc6   :  { %v227_v40 = vpop.f32.mrf.mxu0 }
  0xc7   :  { %v228_v41 = vadd.f32 %v1205_v37, %v227_v40  ;;  %v387_v44 = vmax.f32 %v233_v39, 0.0 }
  0xc8   :  { %v930_v42 = vpop.f32.mrf.mxu0 }
  0xc9   :  { %v386_v43 = vmax.f32 %v228_v41, 0.0  ;;  %v243_v45 = vadd.f32 %v930_v42, %v1205_v37 }
  0xca   :  { %v237_v46 = vpop.f32.mrf.mxu0 }
  0xcb   :  { %v238_v47 = vadd.f32 %v1205_v37, %v237_v46  ;;  %981 = vmatprep.mubr.msk.f32.mxu1 %vm429_vm2, %v386_v43  ;;  %v389_v50 = vmax.f32 %v243_v45, 0.0 }
  0xcc   :  { %v933_v48 = vpop.f32.mrf.mxu0  ;;  %982 = vmatmul.mubr.msk.f32.vlgmr.msra.gmra.mxu1 %vm429_vm2, %v387_v44 }
  0xcd   :  { %v388_v49 = vmax.f32 %v238_v47, 0.0  ;;  %v253_v51 = vadd.f32 %v933_v48, %v1205_v37 }
  0xce   :  { %v247_v52 = vpop.f32.mrf.mxu0 }
  0xcf   :  { %v248_v53 = vadd.f32 %v1205_v37, %v247_v52  ;;  %984 = vmatprep.mubr.msk.f32.mxu1 %vm429_vm2, %v388_v49  ;;  %v391_v56 = vmax.f32 %v253_v51, 0.0 }
  0xd0   :  { %v936_v54 = vpop.f32.mrf.mxu0  ;;  %985 = vmatmul.mubr.msk.f32.gmra.mxu1 %vm429_vm2, %v389_v50 }
  0xd1   :  { %v390_v55 = vmax.f32 %v248_v53, 0.0  ;;  %v263_v57 = vadd.f32 %v936_v54, %v1205_v37 }
  0xd2   :  { %v257_v58 = vpop.f32.mrf.mxu0 }
  0xd3   :  { %v258_v59 = vadd.f32 %v1205_v37, %v257_v58  ;;  %987 = vmatprep.mubr.msk.f32.mxu1 %vm429_vm2, %v390_v55  ;;  %v393_v62 = vmax.f32 %v263_v57, 0.0 }
  0xd4   :  { %v939_v60 = vpop.f32.mrf.mxu0  ;;  %988 = vmatmul.mubr.msk.f32.gmra.mxu1 %vm429_vm2, %v391_v56 }
  0xd5   :  { %v392_v61 = vmax.f32 %v258_v59, 0.0  ;;  %v273_v63 = vadd.f32 %v939_v60, %v1205_v37 }
  0xd6   :  { %v267_v0 = vpop.f32.mrf.mxu0 }
  0xd7   :  { %v268_v1 = vadd.f32 %v1205_v37, %v267_v0  ;;  %990 = vmatprep.mubr.msk.f32.mxu1 %vm429_vm2, %v392_v61  ;;  %v395_v4 = vmax.f32 %v273_v63, 0.0 }
  0xd8   :  { %v942_v2 = vpop.f32.mrf.mxu0  ;;  %991 = vmatmul.mubr.msk.f32.gmra.mxu1 %vm429_vm2, %v393_v62 }
  0xd9   :  { %v394_v3 = vmax.f32 %v268_v1, 0.0  ;;  %v283_v5 = vadd.f32 %v942_v2, %v1205_v37 }
  0xda   :  { %v277_v6 = vpop.f32.mrf.mxu0 }
  0xdb   :  { %v278_v7 = vadd.f32 %v1205_v37, %v277_v6  ;;  %993 = vmatprep.mubr.msk.f32.mxu1 %vm429_vm2, %v394_v3  ;;  %v397_v10 = vmax.f32 %v283_v5, 0.0 }
  0xdc   :  { %v945_v8 = vpop.f32.mrf.mxu0  ;;  %994 = vmatmul.mubr.msk.f32.gmra.mxu1 %vm429_vm2, %v395_v4 }
  0xdd   :  { %v396_v9 = vmax.f32 %v278_v7, 0.0  ;;  %v293_v11 = vadd.f32 %v945_v8, %v1205_v37  ;;  %v1274_v7 = vld [vmem:[%s1440_s4] ss:$0 sm:$0xff] }
  0xde   :  { %v287_v12 = vpop.f32.mrf.mxu0 }
  0xdf   :  { %v288_v13 = vadd.f32 %v1205_v37, %v287_v12  ;;  %996 = vmatprep.mubr.msk.f32.mxu1 %vm429_vm2, %v396_v9  ;;  %v399_v16 = vmax.f32 %v293_v11, 0.0 }
  0xe0   :  { %v948_v14 = vpop.f32.mrf.mxu0  ;;  %997 = vmatmul.mubr.msk.f32.gmra.mxu1 %vm429_vm2, %v397_v10 }
  0xe1   :  { %v398_v15 = vmax.f32 %v288_v13, 0.0  ;;  %v303_v17 = vadd.f32 %v948_v14, %v1205_v37 }
  0xe2   :  { %v297_v18 = vpop.f32.mrf.mxu0 }
  0xe3   :  { %v298_v19 = vadd.f32 %v1205_v37, %v297_v18  ;;  %999 = vmatprep.mubr.msk.f32.mxu1 %vm429_vm2, %v398_v15  ;;  %v401_v22 = vmax.f32 %v303_v17, 0.0 }
  0xe4   :  { %v951_v20 = vpop.f32.mrf.mxu0  ;;  %1000 = vmatmul.mubr.msk.f32.gmra.mxu1 %vm429_vm2, %v399_v16 }
  0xe5   :  { %v400_v21 = vmax.f32 %v298_v19, 0.0  ;;  %v313_v23 = vadd.f32 %v951_v20, %v1205_v37 }
  0xe6   :  { %v307_v24 = vpop.f32.mrf.mxu0 }
  0xe7   :  { %v308_v25 = vadd.f32 %v1205_v37, %v307_v24  ;;  %1002 = vmatprep.mubr.msk.f32.mxu1 %vm429_vm2, %v400_v21  ;;  %v403_v28 = vmax.f32 %v313_v23, 0.0 }
  0xe8   :  { %v954_v26 = vpop.f32.mrf.mxu0  ;;  %1003 = vmatmul.mubr.msk.f32.gmra.mxu1 %vm429_vm2, %v401_v22 }
  0xe9   :  { %v402_v27 = vmax.f32 %v308_v25, 0.0  ;;  %v323_v29 = vadd.f32 %v954_v26, %v1205_v37 }
  0xea   :  { %v317_v30 = vpop.f32.mrf.mxu0 }
  0xeb   :  { %v318_v31 = vadd.f32 %v1205_v37, %v317_v30  ;;  %1005 = vmatprep.mubr.msk.f32.mxu1 %vm429_vm2, %v402_v27  ;;  %v405_v34 = vmax.f32 %v323_v29, 0.0 }
  0xec   :  { %v957_v32 = vpop.f32.mrf.mxu0  ;;  %1006 = vmatmul.mubr.msk.f32.gmra.mxu1 %vm429_vm2, %v403_v28 }
  0xed   :  { %v404_v33 = vmax.f32 %v318_v31, 0.0  ;;  %v333_v35 = vadd.f32 %v957_v32, %v1205_v37 }
  0xee   :  { %v327_v36 = vpop.f32.mrf.mxu0 }
  0xef   :  { %v328_v38 = vadd.f32 %v1205_v37, %v327_v36  ;;  %1008 = vmatprep.mubr.msk.f32.mxu1 %vm429_vm2, %v404_v33  ;;  %v407_v41 = vmax.f32 %v333_v35, 0.0 }
  0xf0   :  { %v960_v39 = vpop.f32.mrf.mxu0  ;;  %1009 = vmatmul.mubr.msk.f32.gmra.mxu1 %vm429_vm2, %v405_v34 }
  0xf1   :  { %v406_v40 = vmax.f32 %v328_v38, 0.0  ;;  %v343_v42 = vadd.f32 %v960_v39, %v1205_v37 }
  0xf2   :  { %v337_v43 = vpop.f32.mrf.mxu0 }
  0xf3   :  { %v338_v44 = vadd.f32 %v1205_v37, %v337_v43  ;;  %1011 = vmatprep.mubr.msk.f32.mxu1 %vm429_vm2, %v406_v40  ;;  %v409_v47 = vmax.f32 %v343_v42, 0.0 }
  0xf4   :  { %v963_v45 = vpop.f32.mrf.mxu0  ;;  %1012 = vmatmul.mubr.msk.f32.gmra.mxu1 %vm429_vm2, %v407_v41 }
  0xf5   :  { %v408_v46 = vmax.f32 %v338_v44, 0.0  ;;  %v353_v48 = vadd.f32 %v963_v45, %v1205_v37 }
  0xf6   :  { %v347_v49 = vpop.f32.mrf.mxu0 }
  0xf7   :  { %v348_v50 = vadd.f32 %v1205_v37, %v347_v49  ;;  %1014 = vmatprep.mubr.msk.f32.mxu1 %vm429_vm2, %v408_v46  ;;  %v411_v53 = vmax.f32 %v353_v48, 0.0 }
  0xf8   :  { %v966_v51 = vpop.f32.mrf.mxu0  ;;  %1015 = vmatmul.mubr.msk.f32.gmra.mxu1 %vm429_vm2, %v409_v47 }
  0xf9   :  { %v410_v52 = vmax.f32 %v348_v50, 0.0  ;;  %v363_v54 = vadd.f32 %v966_v51, %v1205_v37 }
  0xfa   :  { %v357_v55 = vpop.f32.mrf.mxu0 }
  0xfb   :  { %v358_v56 = vadd.f32 %v1205_v37, %v357_v55  ;;  %1017 = vmatprep.mubr.msk.f32.mxu1 %vm429_vm2, %v410_v52  ;;  %v413_v59 = vmax.f32 %v363_v54, 0.0 }
  0xfc   :  { %v969_v57 = vpop.f32.mrf.mxu0  ;;  %1018 = vmatmul.mubr.msk.f32.gmra.mxu1 %vm429_vm2, %v411_v53 }
  0xfd   :  { %v412_v58 = vmax.f32 %v358_v56, 0.0  ;;  %v373_v60 = vadd.f32 %v969_v57, %v1205_v37 }
  0xfe   :  { %v367_v61 = vpop.f32.mrf.mxu0 }
  0xff   :  { %v368_v62 = vadd.f32 %v1205_v37, %v367_v61  ;;  %1020 = vmatprep.mubr.msk.f32.mxu1 %vm429_vm2, %v412_v58  ;;  %v415_v1 = vmax.f32 %v373_v60, 0.0 }
 0x100   :  { %v972_v63 = vpop.f32.mrf.mxu0  ;;  %1021 = vmatmul.mubr.msk.f32.gmra.mxu1 %vm429_vm2, %v413_v59 }
 0x101   :  { %v414_v0 = vmax.f32 %v368_v62, 0.0  ;;  %v383_v2 = vadd.f32 %v972_v63, %v1205_v37 }
 0x102   :  { %v377_v3 = vpop.f32.mrf.mxu0 }
 0x103   :  { %v378_v4 = vadd.f32 %v1205_v37, %v377_v3  ;;  %1023 = vmatprep.mubr.msk.f32.mxu1 %vm429_vm2, %v414_v0  ;;  %v417_v6 = vmax.f32 %v383_v2, 0.0 }
 0x104   :  { %1024 = vmatmul.mubr.msk.f32.gmra.mxu1 %vm429_vm2, %v415_v1 }
 0x105   :  { %v416_v5 = vmax.f32 %v378_v4, 0.0 }
 0x107   :  { %1026 = vmatprep.mubr.msk.f32.mxu1 %vm429_vm2, %v416_v5 }
 0x108   :  { %1027 = vmatmul.mubr.msk.f32.gmra.mxu1 %vm429_vm2, %v417_v6 }
 0x18c   :  { %v983_v8 = vpop.f32.mrf.mxu1 }
 0x18d   :  { %v598_v9 = vadd.f32 %v983_v8, %v1274_v7 }
 0x18e   :  { %v592_v10 = vpop.f32.mrf.mxu1 }
 0x18f   :  { %752 = vst.msk [vmem:[%s1441_s5 + $0x8] sm:$0xff] %vm429_vm2, %v598_v9  ;;  %v593_v37 = vadd.f32 %v1274_v7, %v592_v10 }
 0x190   :  { %v986_v11 = vpop.f32.mrf.mxu1 }
 0x191   :  { %751 = vst.msk [vmem:[%s1441_s5] sm:$0xff] %vm429_vm2, %v593_v37  ;;  %v608_v12 = vadd.f32 %v986_v11, %v1274_v7 }
 0x192   :  { %v602_v13 = vpop.f32.mrf.mxu1 }
 0x193   :  { %754 = vst.msk [vmem:[%s1441_s5 + $0x18] sm:$0xff] %vm429_vm2, %v608_v12  ;;  %v603_v14 = vadd.f32 %v1274_v7, %v602_v13 }
 0x194   :  { %v989_v15 = vpop.f32.mrf.mxu1 }
 0x195   :  { %753 = vst.msk [vmem:[%s1441_s5 + $0x10] sm:$0xff] %vm429_vm2, %v603_v14  ;;  %v618_v16 = vadd.f32 %v989_v15, %v1274_v7 }
 0x196   :  { %v612_v17 = vpop.f32.mrf.mxu1 }
 0x197   :  { %756 = vst.msk [vmem:[%s1441_s5 + $0x28] sm:$0xff] %vm429_vm2, %v618_v16  ;;  %v613_v18 = vadd.f32 %v1274_v7, %v612_v17 }
 0x198   :  { %v992_v19 = vpop.f32.mrf.mxu1 }
 0x199   :  { %755 = vst.msk [vmem:[%s1441_s5 + $0x20] sm:$0xff] %vm429_vm2, %v613_v18  ;;  %v628_v20 = vadd.f32 %v992_v19, %v1274_v7 }
 0x19a   :  { %v622_v21 = vpop.f32.mrf.mxu1 }
 0x19b   :  { %758 = vst.msk [vmem:[%s1441_s5 + $0x38] sm:$0xff] %vm429_vm2, %v628_v20  ;;  %v623_v22 = vadd.f32 %v1274_v7, %v622_v21 }
 0x19c   :  { %v995_v23 = vpop.f32.mrf.mxu1 }
 0x19d   :  { %757 = vst.msk [vmem:[%s1441_s5 + $0x30] sm:$0xff] %vm429_vm2, %v623_v22  ;;  %v638_v24 = vadd.f32 %v995_v23, %v1274_v7 }
 0x19e   :  { %v632_v25 = vpop.f32.mrf.mxu1 }
 0x19f   :  { %760 = vst.msk [vmem:[%s1441_s5 + $0x48] sm:$0xff] %vm429_vm2, %v638_v24  ;;  %v633_v26 = vadd.f32 %v1274_v7, %v632_v25 }
 0x1a0   :  { %v998_v27 = vpop.f32.mrf.mxu1 }
 0x1a1   :  { %759 = vst.msk [vmem:[%s1441_s5 + $0x40] sm:$0xff] %vm429_vm2, %v633_v26  ;;  %v648_v28 = vadd.f32 %v998_v27, %v1274_v7 }
 0x1a2   :  { %v642_v29 = vpop.f32.mrf.mxu1 }
 0x1a3   :  { %762 = vst.msk [vmem:[%s1441_s5 + $0x58] sm:$0xff] %vm429_vm2, %v648_v28  ;;  %v643_v30 = vadd.f32 %v1274_v7, %v642_v29 }
 0x1a4   :  { %v1001_v31 = vpop.f32.mrf.mxu1 }
 0x1a5   :  { %761 = vst.msk [vmem:[%s1441_s5 + $0x50] sm:$0xff] %vm429_vm2, %v643_v30  ;;  %v658_v32 = vadd.f32 %v1001_v31, %v1274_v7 }
 0x1a6   :  { %v652_v33 = vpop.f32.mrf.mxu1 }
 0x1a7   :  { %764 = vst.msk [vmem:[%s1441_s5 + $0x68] sm:$0xff] %vm429_vm2, %v658_v32  ;;  %v653_v34 = vadd.f32 %v1274_v7, %v652_v33 }
 0x1a8   :  { %v1004_v35 = vpop.f32.mrf.mxu1 }
 0x1a9   :  { %763 = vst.msk [vmem:[%s1441_s5 + $0x60] sm:$0xff] %vm429_vm2, %v653_v34  ;;  %v668_v36 = vadd.f32 %v1004_v35, %v1274_v7 }
 0x1aa   :  { %v662_v38 = vpop.f32.mrf.mxu1 }
 0x1ab   :  { %766 = vst.msk [vmem:[%s1441_s5 + $0x78] sm:$0xff] %vm429_vm2, %v668_v36  ;;  %v663_v39 = vadd.f32 %v1274_v7, %v662_v38 }
 0x1ac   :  { %v1007_v40 = vpop.f32.mrf.mxu1 }
 0x1ad   :  { %765 = vst.msk [vmem:[%s1441_s5 + $0x70] sm:$0xff] %vm429_vm2, %v663_v39  ;;  %v678_v41 = vadd.f32 %v1007_v40, %v1274_v7 }
 0x1ae   :  { %v672_v42 = vpop.f32.mrf.mxu1 }
 0x1af   :  { %768 = vst.msk [vmem:[%s1441_s5 + $0x88] sm:$0xff] %vm429_vm2, %v678_v41  ;;  %v673_v43 = vadd.f32 %v1274_v7, %v672_v42 }
 0x1b0   :  { %v1010_v44 = vpop.f32.mrf.mxu1 }
 0x1b1   :  { %767 = vst.msk [vmem:[%s1441_s5 + $0x80] sm:$0xff] %vm429_vm2, %v673_v43  ;;  %v688_v45 = vadd.f32 %v1010_v44, %v1274_v7 }
 0x1b2   :  { %v682_v46 = vpop.f32.mrf.mxu1 }
 0x1b3   :  { %770 = vst.msk [vmem:[%s1441_s5 + $0x98] sm:$0xff] %vm429_vm2, %v688_v45  ;;  %v683_v47 = vadd.f32 %v1274_v7, %v682_v46 }
 0x1b4   :  { %v1013_v48 = vpop.f32.mrf.mxu1 }
 0x1b5   :  { %769 = vst.msk [vmem:[%s1441_s5 + $0x90] sm:$0xff] %vm429_vm2, %v683_v47  ;;  %v698_v49 = vadd.f32 %v1013_v48, %v1274_v7 }
 0x1b6   :  { %v692_v50 = vpop.f32.mrf.mxu1 }
 0x1b7   :  { %772 = vst.msk [vmem:[%s1441_s5 + $0xa8] sm:$0xff] %vm429_vm2, %v698_v49  ;;  %v693_v51 = vadd.f32 %v1274_v7, %v692_v50 }
 0x1b8   :  { %v1016_v52 = vpop.f32.mrf.mxu1 }
 0x1b9   :  { %771 = vst.msk [vmem:[%s1441_s5 + $0xa0] sm:$0xff] %vm429_vm2, %v693_v51  ;;  %v708_v53 = vadd.f32 %v1016_v52, %v1274_v7 }
 0x1ba   :  { %v702_v54 = vpop.f32.mrf.mxu1 }
 0x1bb   :  { %774 = vst.msk [vmem:[%s1441_s5 + $0xb8] sm:$0xff] %vm429_vm2, %v708_v53  ;;  %v703_v55 = vadd.f32 %v1274_v7, %v702_v54 }
 0x1bc   :  { %v1019_v56 = vpop.f32.mrf.mxu1 }
 0x1bd   :  { %773 = vst.msk [vmem:[%s1441_s5 + $0xb0] sm:$0xff] %vm429_vm2, %v703_v55  ;;  %v718_v57 = vadd.f32 %v1019_v56, %v1274_v7 }
 0x1be   :  { %v712_v58 = vpop.f32.mrf.mxu1 }
 0x1bf   :  { %776 = vst.msk [vmem:[%s1441_s5 + $0xc8] sm:$0xff] %vm429_vm2, %v718_v57  ;;  %v713_v59 = vadd.f32 %v1274_v7, %v712_v58 }
 0x1c0   :  { %v1022_v60 = vpop.f32.mrf.mxu1 }
 0x1c1   :  { %775 = vst.msk [vmem:[%s1441_s5 + $0xc0] sm:$0xff] %vm429_vm2, %v713_v59  ;;  %v728_v61 = vadd.f32 %v1022_v60, %v1274_v7 }
 0x1c2   :  { %v722_v62 = vpop.f32.mrf.mxu1 }
 0x1c3   :  { %778 = vst.msk [vmem:[%s1441_s5 + $0xd8] sm:$0xff] %vm429_vm2, %v728_v61  ;;  %v723_v63 = vadd.f32 %v1274_v7, %v722_v62 }
 0x1c4   :  { %v1025_v0 = vpop.f32.mrf.mxu1 }
 0x1c5   :  { %777 = vst.msk [vmem:[%s1441_s5 + $0xd0] sm:$0xff] %vm429_vm2, %v723_v63  ;;  %v738_v1 = vadd.f32 %v1025_v0, %v1274_v7 }
 0x1c6   :  { %v732_v2 = vpop.f32.mrf.mxu1 }
 0x1c7   :  { %780 = vst.msk [vmem:[%s1441_s5 + $0xe8] sm:$0xff] %vm429_vm2, %v738_v1  ;;  %v733_v3 = vadd.f32 %v1274_v7, %v732_v2 }
 0x1c8   :  { %v1028_v4 = vpop.f32.mrf.mxu1 }
 0x1c9   :  { %779 = vst.msk [vmem:[%s1441_s5 + $0xe0] sm:$0xff] %vm429_vm2, %v733_v3  ;;  %v748_v5 = vadd.f32 %v1028_v4, %v1274_v7 }
 0x1ca   :  { %v742_v6 = vpop.f32.mrf.mxu1 }
 0x1cb   :  { %782 = vst.msk [vmem:[%s1441_s5 + $0xf8] sm:$0xff] %vm429_vm2, %v748_v5  ;;  %v743_v8 = vadd.f32 %v1274_v7, %v742_v6 }
 0x1cd   :  { %781 = vst.msk [vmem:[%s1441_s5 + $0xf0] sm:$0xff] %vm429_vm2, %v743_v8 }

</bundles_post_ra>
